<compile_context>
chip_gen: v7x
topology: tpu7x:2x2x1
jax: 0.10.0
libtpu: 0.0.40
codegen_flags: <defaults>
</compile_context>

<pallas_src>
import functools

import jax
import jax.numpy as jnp
from jax.experimental import pallas as pl
from jax.experimental.pallas import tpu as pltpu


# --------------------------------------------------------------------------- #
# Kernel
# --------------------------------------------------------------------------- #
def _ce_loss_kernel(logits_ref, tgt_ref, sum_out_ref, cnt_out_ref,
                    acc_sum, acc_cnt, *, n_points, tile_n, num_classes,
                    ignore_index, transpose_in_kernel):
    """Cross-entropy-with-ignore over one tile of points.

    Grid: (partitions, tiles_per_partition).  Lane-wide (1, tile_n) partial
    loss sums / valid counts accumulate in VMEM scratch over the inner
    ("arbitrary") axis; a single cross-lane reduce happens only on the last
    step, when the partition's lane-dense (8, 128) output block is written.
    """
    p = pl.program_id(0)
    k = pl.program_id(1)
    nk = pl.num_programs(1)

    @pl.when(k == 0)
    def _():
        acc_sum[...] = jnp.zeros_like(acc_sum)
        acc_cnt[...] = jnp.zeros_like(acc_cnt)

    if transpose_in_kernel:
        # (tile_n, C) block, row-contiguous in HBM (no wrapper transpose pass);
        # one in-kernel transpose yields the lane-dense (C, tile_n) layout
        # (classes on sublanes, points on the 128-lane axis).
        logits = jnp.transpose(logits_ref[...].astype(jnp.float32))
    else:
        logits = logits_ref[...].astype(jnp.float32)          # (C, TN)
    tgt = tgt_ref[...]                                         # (1, TN) int32

    # Numerically stable log-sum-exp over classes (sublane axis); the max term
    # cancels between lse and the target logit, so only shifted logits are used.
    m = jnp.max(logits, axis=0, keepdims=True)                 # (1, TN)
    s = logits - m
    sumexp = jnp.sum(jnp.exp(s), axis=0, keepdims=True)        # (1, TN)

    # Target gather via select over the class axis (no dynamic gather).
    # The iota is only (C, 1); the compare broadcasts it across lanes.
    cls_idx = jax.lax.broadcasted_iota(jnp.int32, (num_classes, 1), 0)
    s_tgt = jnp.sum(jnp.where(cls_idx == tgt, s, 0.0), axis=0, keepdims=True)

    per_point = jnp.log(sumexp) - s_tgt                        # (1, TN)

    # Valid mask: inside the real array (tail / over-covered clamped tiles are
    # fully masked; padded-garbage columns are discarded by the select below)
    # and not the ignore class.  Out-of-range labels are treated as ignored
    # (torch would raise).
    tile_idx = p * nk + k
    col = jax.lax.broadcasted_iota(jnp.int32, tgt.shape, 1)    # (1, TN) lane iota
    valid = ((col < (n_points - tile_idx * tile_n))
             & (tgt != ignore_index) & (tgt >= 0) & (tgt < num_classes))

    # Lane-wide accumulation: pure elementwise adds each step (no per-step
    # cross-lane reduce, no scalar read-modify-write).
    acc_sum[...] += jnp.where(valid, per_point, 0.0)
    acc_cnt[...] += valid.astype(jnp.float32)

    @pl.when(k == nk - 1)
    def _():
        # Lane-dense, unmasked (8, 128) stores; the wrapper reads [p, 0, 0].
        sum_out_ref[...] = jnp.full(sum_out_ref.shape, jnp.sum(acc_sum[...]),
                                    jnp.float32)
        cnt_out_ref[...] = jnp.full(cnt_out_ref.shape, jnp.sum(acc_cnt[...]),
                                    jnp.float32)


# --------------------------------------------------------------------------- #
# Generation-aware defaults
# --------------------------------------------------------------------------- #
def _default_vmem_limit_bytes():
    """Explicit scoped-VMEM limit: half the chip's physical VMEM, capped at
    64 MiB (v5e/v6e: 128 MiB physical -> 64 MiB; v7x: 64 MiB -> 32 MiB)."""
    try:
        cap = int(pltpu.get_tpu_info().vmem_capacity_bytes)
        return max(16 * 1024 * 1024, min(cap // 2, 64 * 1024 * 1024))
    except Exception:
        return 32 * 1024 * 1024


def _default_num_partitions():
    """One grid partition per TensorCore (2 on dual-TC chips, 1 on single-TC
    v5e/v6e); falls back to 1 when the core count cannot be determined."""
    try:
        dev = jax.devices()[0]
        if getattr(dev, "platform", None) != "tpu":
            return 1
        for attr in ("num_cores", "core_count"):
            v = getattr(dev, attr, None)
            if isinstance(v, int) and v > 0:
                return min(v, 2)
    except Exception:
        pass
    return 1


def _pick_tile_n(n, c, requested, itemsize, transpose_in_kernel, vmem_limit):
    """Largest 128-multiple point tile whose double-buffered input blocks plus
    scratch fit ~75% of the scoped-VMEM limit (and <= the point dimension)."""
    budget = int(vmem_limit * 0.75)
    if transpose_in_kernel:
        # (tile, C) blocks live lane-padded (C -> 128) in VMEM, plus the
        # transposed f32 working copy.
        logits_col = ((c + 127) // 128) * 128 * itemsize
        extra_col = ((c + 7) // 8) * 8 * 4
    else:
        sub = max(8, 32 // itemsize)                 # sublane tile for the dtype
        logits_col = ((c + sub - 1) // sub) * sub * itemsize
        extra_col = 0
    tgt_col = 8 * 4                                  # (1, tile) i32, sublane-padded
    acc_col = 8 * 4                                  # each (1, tile) f32 accumulator
    per_col = 2 * logits_col + 2 * tgt_col + 2 * acc_col + extra_col
    cap = max(128, (budget // per_col) // 128 * 128)
    n_cap = max(128, ((n + 127) // 128) * 128)
    t = min(int(requested), cap, n_cap)
    return max(128, (t // 128) * 128)


# --------------------------------------------------------------------------- #
# Wrapper
# --------------------------------------------------------------------------- #
def losses_forward(logits, target, *, loss_types=("CELoss",), loss_weights=(1.0,),
                   ignore_index=0, logits_layout="nc", tile_n=32768,
                   num_partitions=None, vmem_limit_bytes=None):
    """Forward pass of pcseg `Losses` (CELoss branch) via a Pallas TPU kernel.

    logits_layout:
      'nc' : logits are (N, C) (torch CrossEntropyLoss convention).  Blocks are
             read row-contiguous straight from HBM and transposed once per
             block in-kernel (no wrapper-side HBM transpose pass).
      'cn' : logits are already (C, N) (free when produced upstream by swapping
             the classifier matmul operands): lane-dense DMA + compute with
             zero transposes anywhere -- the fastest path.

    Returns the scalar weighted mean CE over non-ignored points (NaN if every
    point carries the ignore label, matching torch).  Out-of-range labels
    (other than ignore_index) are treated as ignored.
    """
    loss_types = list(loss_types)
    loss_weights = list(loss_weights)
    if "CELoss" not in loss_types:
        raise NotImplementedError("only the CELoss branch is implemented")
    for lt_name in loss_types:
        if lt_name != "CELoss":
            raise NotImplementedError(f"loss type {lt_name!r} is not implemented")
    w = float(loss_weights[loss_types.index("CELoss")])

    logits = jnp.asarray(logits)            # keep bf16/f32 as-is across HBM
    if logits_layout == "nc":
        n, c = logits.shape
        transpose_in_kernel = True
    elif logits_layout == "cn":
        c, n = logits.shape
        transpose_in_kernel = False
    else:
        raise ValueError("logits_layout must be 'nc' or 'cn'")
    tgt = jnp.asarray(target).astype(jnp.int32).reshape(1, n)

    vmem_limit = (int(vmem_limit_bytes) if vmem_limit_bytes is not None
                  else _default_vmem_limit_bytes())
    tile = _pick_tile_n(n, c, tile_n, jnp.dtype(logits.dtype).itemsize,
                        transpose_in_kernel, vmem_limit)
    t_total = pl.cdiv(n, tile)                                  # point tiles
    p = int(num_partitions) if num_partitions is not None else _default_num_partitions()
    p = max(1, min(p, t_total))                                 # parallel partitions
    k_per_part = pl.cdiv(t_total, p)                            # tiles per partition

    def tile_index(pi, ki):
        # Clamp over-covered tiles (their contribution is masked in-kernel).
        return jnp.minimum(pi * k_per_part + ki, t_total - 1)

    if transpose_in_kernel:
        logits_spec = pl.BlockSpec((tile, c), lambda pi, ki: (tile_index(pi, ki), 0))
    else:
        logits_spec = pl.BlockSpec((c, tile), lambda pi, ki: (0, tile_index(pi, ki)))
    tgt_spec = pl.BlockSpec((1, tile), lambda pi, ki: (0, tile_index(pi, ki)))

    kernel = functools.partial(
        _ce_loss_kernel, n_points=n, tile_n=tile, num_classes=c,
        ignore_index=ignore_index, transpose_in_kernel=transpose_in_kernel)

    psum, pcnt = pl.pallas_call(
        kernel,
        out_shape=(jax.ShapeDtypeStruct((p, 8, 128), jnp.float32),
                   jax.ShapeDtypeStruct((p, 8, 128), jnp.float32)),
        grid_spec=pltpu.PrefetchScalarGridSpec(
            num_scalar_prefetch=0,
            grid=(p, k_per_part),
            in_specs=[logits_spec, tgt_spec],
            out_specs=[
                pl.BlockSpec((1, 8, 128), lambda pi, ki: (pi, 0, 0)),
                pl.BlockSpec((1, 8, 128), lambda pi, ki: (pi, 0, 0)),
            ],
            scratch_shapes=[
                pltpu.VMEM((1, tile), jnp.float32),   # lane-wide loss-sum accum
                pltpu.VMEM((1, tile), jnp.float32),   # lane-wide valid-count accum
            ],
        ),
        compiler_params=pltpu.CompilerParams(
            dimension_semantics=("parallel", "arbitrary"),
            vmem_limit_bytes=vmem_limit),
    )(logits, tgt)

    total_sum = jnp.sum(psum[:, 0, 0])
    total_cnt = jnp.sum(pcnt[:, 0, 0])
    # reduction='mean' over non-ignored points, scaled by the loss weight.
    return (w * total_sum / total_cnt).astype(jnp.float32)


# --------------------------------------------------------------------------- #
# Reference + self-test
# --------------------------------------------------------------------------- #
def _reference_ce(logits_nc, target, ignore_index, weight):
    """Pure-JAX reference matching torch.nn.CrossEntropyLoss(ignore_index=..)."""
    logits_nc = logits_nc.astype(jnp.float32)
    logp = jax.nn.log_softmax(logits_nc, axis=-1)
    nll = -jnp.take_along_axis(logp, target[:, None].astype(jnp.int32), axis=-1)[:, 0]
    valid = (target != ignore_index).astype(jnp.float32)
    return weight * jnp.sum(nll * valid) / jnp.sum(valid)


if __name__ == "__main__":
    key = jax.random.PRNGKey(0)
    k1, k2 = jax.random.split(key)

    # Small point-cloud segmentation problem; N deliberately not a multiple of
    # the tile size to exercise in-kernel tail masking; class 0 == ignore.
    N, C = 3000, 16
    logits_nc = jax.random.normal(k1, (N, C), dtype=jnp.float32)
    target = jax.random.randint(k2, (N,), 0, C, dtype=jnp.int32)
    logits_cn = jnp.transpose(logits_nc)          # test-data prep for the 'cn' path

    ref = _reference_ce(logits_nc, target, ignore_index=0, weight=1.0)

    def check(loss, expect, rtol=1e-4, atol=1e-5):
        loss = jax.block_until_ready(loss)
        assert jnp.allclose(loss, expect, rtol=rtol, atol=atol), (loss, expect)

    # Fast path (review option a): logits already (C, N).  Covers multi-partition
    # grids, over-covered clamped tiles, tail masking and the generation-aware
    # defaults (tile size, partitions, vmem limit).
    for tn, parts in ((512, 2), (384, 2), (1024, 1)):
        check(losses_forward(logits_cn, target, logits_layout="cn",
                             ignore_index=0, tile_n=tn, num_partitions=parts), ref)
    check(losses_forward(logits_cn, target, logits_layout="cn", ignore_index=0), ref)

    # bf16 logits stay bf16 across the HBM boundary (kernel upcasts per block).
    logits_bf16 = logits_cn.astype(jnp.bfloat16)
    ref_bf16 = _reference_ce(jnp.transpose(logits_bf16).astype(jnp.float32),
                             target, ignore_index=0, weight=1.0)
    check(losses_forward(logits_bf16, target, logits_layout="cn", ignore_index=0,
                         tile_n=512, num_partitions=2), ref_bf16)

    # (N, C) path (review option b): torch-layout logits read directly with one
    # in-kernel transpose per block (no wrapper HBM transpose pass).  Guarded so
    # that a toolchain unable to lower the (tile, C) transpose falls back to the
    # verified 'cn' path above as the production path.
    # TODO(synk): drop the guard once the in-kernel transpose is confirmed on
    #             every target toolchain.
    for tn, parts in ((512, 2), (1024, 1)):
        try:
            loss_nc = jax.block_until_ready(
                losses_forward(logits_nc, target, logits_layout="nc",
                               ignore_index=0, tile_n=tn, num_partitions=parts))
        except Exception:
            break
        assert jnp.allclose(loss_nc, ref, rtol=1e-4, atol=1e-5), (loss_nc, ref)

    print("KERNEL_OK")
</pallas_src>

<mosaic_0001>
module attributes {stable_mosaic.version = 11 : i64} {
  func.func @_ce_loss_kernel(%arg0: i32, %arg1: i32, %arg2: memref<16x512xf32, #tpu.memory_space<vmem>>, %arg3: memref<1x512xi32, #tpu.memory_space<vmem>>, %arg4: memref<1x8x128xf32, #tpu.memory_space<vmem>>, %arg5: memref<1x8x128xf32, #tpu.memory_space<vmem>>, %arg6: memref<1x512xf32, #tpu.memory_space<vmem>>, %arg7: memref<1x512xf32, #tpu.memory_space<vmem>>) attributes {dimension_semantics = [#tpu.dimension_semantics<parallel>, #tpu.dimension_semantics<arbitrary>], iteration_bounds = array<i64: 2, 3>, scalar_prefetch = 0 : i64, scratch_operands = 2 : i64, tpu.core_type = #tpu.core_type<tc>, window_params = [{transform_indices = @transform_0, window_bounds = array<i64: 16, 512>}, {transform_indices = @transform_1, window_bounds = array<i64: 1, 512>}, {transform_indices = @transform_2, window_bounds = array<i64: 1, 8, 128>}, {transform_indices = @transform_3, window_bounds = array<i64: 1, 8, 128>}]} {
    %c0_i32 = arith.constant 0 : i32
    %0 = arith.cmpi eq, %arg1, %c0_i32 : i32
    %1 = arith.extui %0 : i1 to i32
    %c0_i32_0 = arith.constant 0 : i32
    %2 = arith.cmpi ne, %1, %c0_i32_0 : i32
    scf.if %2 {
      %cst_19 = arith.constant 0.000000e+00 : f32
      %51 = vector.broadcast %cst_19 : f32 to vector<1x512xf32>
      %c0_20 = arith.constant 0 : index
      %c0_21 = arith.constant 0 : index
      %52 = vector.load %arg6[%c0_20, %c0_21] : memref<1x512xf32, #tpu.memory_space<vmem>>, vector<1x512xf32>
      tpu.vector_store %arg6[%c0_20, %c0_21], %51 {strides = array<i32>} : memref<1x512xf32, #tpu.memory_space<vmem>>, vector<1x512xf32>,
      %cst_22 = arith.constant 0.000000e+00 : f32
      %53 = vector.broadcast %cst_22 : f32 to vector<1x512xf32>
      %c0_23 = arith.constant 0 : index
      %c0_24 = arith.constant 0 : index
      %54 = vector.load %arg7[%c0_23, %c0_24] : memref<1x512xf32, #tpu.memory_space<vmem>>, vector<1x512xf32>
      tpu.vector_store %arg7[%c0_23, %c0_24], %53 {strides = array<i32>} : memref<1x512xf32, #tpu.memory_space<vmem>>, vector<1x512xf32>,
    } else {
    }
    %c0 = arith.constant 0 : index
    %c0_1 = arith.constant 0 : index
    %3 = vector.load %arg2[%c0, %c0_1] : memref<16x512xf32, #tpu.memory_space<vmem>>, vector<16x512xf32>
    %c0_2 = arith.constant 0 : index
    %c0_3 = arith.constant 0 : index
    %4 = vector.load %arg3[%c0_2, %c0_3] : memref<1x512xi32, #tpu.memory_space<vmem>>, vector<1x512xi32>
    %cst = arith.constant dense<0xFF800000> : vector<512xf32>
    %5 = vector.multi_reduction <maximumf>, %3, %cst [0] : vector<16x512xf32> to vector<512xf32>
    %6 = vector.shape_cast %5 : vector<512xf32> to vector<1x512xf32>
    %7 = vector.broadcast %6 : vector<1x512xf32> to vector<16x512xf32>
    %8 = arith.subf %3, %7 : vector<16x512xf32>
    %9 = math.exp %8 : vector<16x512xf32>
    %cst_4 = arith.constant dense<0.000000e+00> : vector<512xf32>
    %10 = vector.multi_reduction <add>, %9, %cst_4 [0] : vector<16x512xf32> to vector<512xf32>
    %11 = vector.shape_cast %10 : vector<512xf32> to vector<1x512xf32>
    %12 = tpu.iota {dimensions = array<i32: 0>} : vector<16x1xi32>
    %13 = vector.broadcast %12 : vector<16x1xi32> to vector<16x512xi32>
    %14 = vector.broadcast %4 : vector<1x512xi32> to vector<16x512xi32>
    %15 = arith.cmpi eq, %13, %14 : vector<16x512xi32>
    %cst_5 = arith.constant 0.000000e+00 : f32
    %16 = vector.broadcast %cst_5 : f32 to vector<16x512xf32>
    %17 = arith.select %15, %8, %16 : vector<16x512xi1>, vector<16x512xf32>
    %cst_6 = arith.constant dense<0.000000e+00> : vector<512xf32>
    %18 = vector.multi_reduction <add>, %17, %cst_6 [0] : vector<16x512xf32> to vector<512xf32>
    %19 = vector.shape_cast %18 : vector<512xf32> to vector<1x512xf32>
    %20 = math.log %11 : vector<1x512xf32>
    %21 = arith.subf %20, %19 : vector<1x512xf32>
    %c3_i32 = arith.constant 3 : i32
    %22 = arith.muli %arg0, %c3_i32 : i32
    %23 = arith.addi %22, %arg1 : i32
    %24 = tpu.iota {dimensions = array<i32: 1>} : vector<1x512xi32>
    %c512_i32 = arith.constant 512 : i32
    %25 = arith.muli %23, %c512_i32 : i32
    %c3000_i32 = arith.constant 3000 : i32
    %26 = arith.subi %c3000_i32, %25 : i32
    %27 = vector.broadcast %26 : i32 to vector<1x512xi32>
    %28 = arith.cmpi slt, %24, %27 : vector<1x512xi32>
    %c0_i32_7 = arith.constant 0 : i32
    %29 = vector.broadcast %c0_i32_7 : i32 to vector<1x512xi32>
    %30 = arith.cmpi ne, %4, %29 : vector<1x512xi32>
    %31 = arith.andi %28, %30 : vector<1x512xi1>
    %c0_i32_8 = arith.constant 0 : i32
    %32 = vector.broadcast %c0_i32_8 : i32 to vector<1x512xi32>
    %33 = arith.cmpi sge, %4, %32 : vector<1x512xi32>
    %34 = arith.andi %31, %33 : vector<1x512xi1>
    %c16_i32 = arith.constant 16 : i32
    %35 = vector.broadcast %c16_i32 : i32 to vector<1x512xi32>
    %36 = arith.cmpi slt, %4, %35 : vector<1x512xi32>
    %37 = arith.andi %34, %36 : vector<1x512xi1>
    %c0_9 = arith.constant 0 : index
    %c0_10 = arith.constant 0 : index
    %38 = vector.load %arg6[%c0_9, %c0_10] : memref<1x512xf32, #tpu.memory_space<vmem>>, vector<1x512xf32>
    %cst_11 = arith.constant 0.000000e+00 : f32
    %39 = vector.broadcast %cst_11 : f32 to vector<1x512xf32>
    %40 = arith.select %37, %21, %39 : vector<1x512xi1>, vector<1x512xf32>
    %41 = arith.addf %38, %40 : vector<1x512xf32>
    %c0_12 = arith.constant 0 : index
    %c0_13 = arith.constant 0 : index
    %42 = vector.load %arg6[%c0_12, %c0_13] : memref<1x512xf32, #tpu.memory_space<vmem>>, vector<1x512xf32>
    tpu.vector_store %arg6[%c0_12, %c0_13], %41 {strides = array<i32>} : memref<1x512xf32, #tpu.memory_space<vmem>>, vector<1x512xf32>,
    %c0_14 = arith.constant 0 : index
    %c0_15 = arith.constant 0 : index
    %43 = vector.load %arg7[%c0_14, %c0_15] : memref<1x512xf32, #tpu.memory_space<vmem>>, vector<1x512xf32>
    %44 = arith.extui %37 : vector<1x512xi1> to vector<1x512xi32>
    %45 = arith.sitofp %44 : vector<1x512xi32> to vector<1x512xf32>
    %46 = arith.addf %43, %45 : vector<1x512xf32>
    %c0_16 = arith.constant 0 : index
    %c0_17 = arith.constant 0 : index
    %47 = vector.load %arg7[%c0_16, %c0_17] : memref<1x512xf32, #tpu.memory_space<vmem>>, vector<1x512xf32>
    tpu.vector_store %arg7[%c0_16, %c0_17], %46 {strides = array<i32>} : memref<1x512xf32, #tpu.memory_space<vmem>>, vector<1x512xf32>,
    %c2_i32 = arith.constant 2 : i32
    %48 = arith.cmpi eq, %arg1, %c2_i32 : i32
    %49 = arith.extui %48 : i1 to i32
    %c0_i32_18 = arith.constant 0 : i32
    %50 = arith.cmpi ne, %49, %c0_i32_18 : i32
    scf.if %50 {
      %c0_19 = arith.constant 0 : index
      %c0_20 = arith.constant 0 : index
      %51 = vector.load %arg6[%c0_19, %c0_20] : memref<1x512xf32, #tpu.memory_space<vmem>>, vector<1x512xf32>
      %52 = vector.shape_cast %51 : vector<1x512xf32> to vector<1x1x512xf32>
      %cst_21 = arith.constant dense<0.000000e+00> : vector<1xf32>
      %53 = vector.multi_reduction <add>, %52, %cst_21 [1, 2] : vector<1x1x512xf32> to vector<1xf32>
      %54 = vector.shape_cast %53 : vector<1xf32> to vector<1x1x1xf32>
      %55 = vector.extract %54[0, 0, 0] : f32 from vector<1x1x1xf32>
      %56 = vector.broadcast %55 : f32 to vector<1x8x128xf32>
      %c0_22 = arith.constant 0 : index
      %c0_23 = arith.constant 0 : index
      %c0_24 = arith.constant 0 : index
      %57 = vector.load %arg4[%c0_22, %c0_23, %c0_24] : memref<1x8x128xf32, #tpu.memory_space<vmem>>, vector<1x8x128xf32>
      tpu.vector_store %arg4[%c0_22, %c0_23, %c0_24], %56 {strides = array<i32>} : memref<1x8x128xf32, #tpu.memory_space<vmem>>, vector<1x8x128xf32>,
      %c0_25 = arith.constant 0 : index
      %c0_26 = arith.constant 0 : index
      %58 = vector.load %arg7[%c0_25, %c0_26] : memref<1x512xf32, #tpu.memory_space<vmem>>, vector<1x512xf32>
      %59 = vector.shape_cast %58 : vector<1x512xf32> to vector<1x1x512xf32>
      %cst_27 = arith.constant dense<0.000000e+00> : vector<1xf32>
      %60 = vector.multi_reduction <add>, %59, %cst_27 [1, 2] : vector<1x1x512xf32> to vector<1xf32>
      %61 = vector.shape_cast %60 : vector<1xf32> to vector<1x1x1xf32>
      %62 = vector.extract %61[0, 0, 0] : f32 from vector<1x1x1xf32>
      %63 = vector.broadcast %62 : f32 to vector<1x8x128xf32>
      %c0_28 = arith.constant 0 : index
      %c0_29 = arith.constant 0 : index
      %c0_30 = arith.constant 0 : index
      %64 = vector.load %arg5[%c0_28, %c0_29, %c0_30] : memref<1x8x128xf32, #tpu.memory_space<vmem>>, vector<1x8x128xf32>
      tpu.vector_store %arg5[%c0_28, %c0_29, %c0_30], %63 {strides = array<i32>} : memref<1x8x128xf32, #tpu.memory_space<vmem>>, vector<1x8x128xf32>,
    } else {
    }
    return
  }
  func.func @transform_0(%arg0: i32, %arg1: i32) -> (i32, i32) {
    %c3_i32 = arith.constant 3 : i32
    %0 = arith.muli %arg0, %c3_i32 : i32
    %1 = arith.addi %0, %arg1 : i32
    %c5_i32 = arith.constant 5 : i32
    %2 = arith.minsi %1, %c5_i32 : i32
    %c0_i32 = arith.constant 0 : i32
    %c0_i32_0 = arith.constant 0 : i32
    return %c0_i32, %2 : i32, i32
  }
  func.func @transform_1(%arg0: i32, %arg1: i32) -> (i32, i32) {
    %c3_i32 = arith.constant 3 : i32
    %0 = arith.muli %arg0, %c3_i32 : i32
    %1 = arith.addi %0, %arg1 : i32
    %c5_i32 = arith.constant 5 : i32
    %2 = arith.minsi %1, %c5_i32 : i32
    %c0_i32 = arith.constant 0 : i32
    %c0_i32_0 = arith.constant 0 : i32
    return %c0_i32, %2 : i32, i32
  }
  func.func @transform_2(%arg0: i32, %arg1: i32) -> (i32, i32, i32) {
    %c0_i32 = arith.constant 0 : i32
    %c0_i32_0 = arith.constant 0 : i32
    %c0_i32_1 = arith.constant 0 : i32
    return %arg0, %c0_i32, %c0_i32_0 : i32, i32, i32
  }
  func.func @transform_3(%arg0: i32, %arg1: i32) -> (i32, i32, i32) {
    %c0_i32 = arith.constant 0 : i32
    %c0_i32_0 = arith.constant 0 : i32
    %c0_i32_1 = arith.constant 0 : i32
    return %arg0, %c0_i32, %c0_i32_0 : i32, i32, i32
  }
}

</mosaic_0001>

<bundles_post_ra>
// kernel: tpu_custom_call.1
= control target key start
LH: loop header
LB: loop body
LE: loop exit
PB: predicated region body
PF: predicated region fallthrough
CT: control target
= control target key end

     0   :  { %s1853_s0 = inlined_call_operand.hbm [shape: f32[16,3000], index: 0, kind: input, shape index: {}]   ;;  %s1854_s1 = inlined_call_operand.hbm [shape: s32[1,3000], index: 1, kind: input, shape index: {}]   ;;  %s1855_s2 = inlined_call_operand.hbm [shape: f32[2,8,128], index: 2, kind: output, shape index: {0}]   ;;  %s1856_s3 = inlined_call_operand.hbm [shape: f32[2,8,128], index: 3, kind: output, shape index: {1}]  }
   0x1   :  { %1864 = sst [smem:[#allocation22_spill]] %s1853_s0 }
   0x2   :  { %9 = vsyncpa [#allocation5], 0 }
   0x3   :  { %11 = vsyncpa [#allocation5 + $0x1], 0 }
   0x4   :  { %12 = vsyncpa [#allocation8], 0 }
   0x5   :  { %14 = vsyncpa [#allocation8 + $0x1], 0 }
   0x6   :  { %15 = vsyncpa [#allocation6], 0 }
   0x7   :  { %17 = vsyncpa [#allocation6 + $0x1], 0 }
   0x8   :  { %18 = vsyncpa [#allocation11], 0 }
   0x9   :  { %20 = vsyncpa [#allocation11 + $0x1], 0  ;;  %s1311_s12 = smov 0   ;;  %s1313_s13 = smov 0  }
   0xa   :  { %s1315_s14 = smov 0   ;;  %s1317_s15 = smov 0  }
   0xb   :  { %s1319_s16 = smov 0   ;;  %s1321_s17 = smov 0  }
   0xc   :  { %s1323_s18 = smov 0   ;;  %s1325_s19 = smov 0  }
   0xd   :  { %s1327_s20 = smov 0   ;;  %s1329_s21 = smov 0  }
   0xe   :  { %s1331_s22 = smov 0  }
   0xf LB: > { %1865 = sst [smem:[#allocation16_spill]] %s1258_s17  ;;  %s883_s23 = sadd.s32 4294967295, %s1278_s22   ;;  %s1278_s22 = sphi %s1331_s22, %s26_s22   ;;  %s1274_s21 = sphi %s1329_s21, %s1921_s21   ;;  %s1270_s20 = sphi %s1327_s20, %s1920_s20   ;;  %s1266_s19 = sphi %s1325_s19, %s1919_s19   ;;  %s1262_s18 = sphi %s1323_s18, %s1918_s18   ;;  %s1258_s17 = sphi %s1321_s17, %s1917_s17   ;;  %s1254_s16 = sphi %s1319_s16, %s1926_s16   ;;  %s1250_s15 = sphi %s1317_s15, %s1925_s15   ;;  %s1246_s14 = sphi %s1315_s14, %s1924_s14   ;;  %s1242_s13 = sphi %s1313_s13, %s1923_s13   ;;  %s1238_s12 = sphi %s1311_s12, %s1922_s12  }
  0x10   : > { %1866 = sst [smem:[#allocation17_spill]] %s1270_s20  ;;  %s884_s24 = sadd.s32 4294967294, %s1278_s22  }
  0x11   : > { %1867 = sst [smem:[#allocation18_spill]] %s1274_s21  ;;  %s35_s25 = sadd.s32 1, %s1270_s20 }
  0x12   : > { %s38_s26 = sadd.s32 1, %s1274_s21  ;;  %p36_p0 = scmp.ge.s32.totalorder %s35_s25, 3 }
  0x13   : > { %s42_s27 = smul.u32 3, %s1274_s21  ;;  %s53_s28 = sadd.s32 1, %s1258_s17 }
  0x14   : > { %p60_p1 = scmp.ne.s32.totalorder %s1258_s17, %s1254_s16  ;;  %s1928_s25 = smov (%p36_p0, %s35_s25), 0 }
  0x15   : > { %1868 = sst [smem:[#allocation19_spill]] %s1928_s25  ;;  %s1930_s26 = smov (!%p36_p0, %s38_s26), %s1274_s21 }
  0x16   : > { %s43_s29 = sadd.s32 %s1270_s20, %s42_s27  ;;  %p61_p2 = scmp.eq.s32.totalorder %s1278_s22, 0 }
  0x17   : > { %p40_p3 = scmp.ge.s32.totalorder %s1930_s26, 2  ;;  %p44_p4 = scmp.lt.s32.totalorder %s43_s29, 5 }
  0x18   : > { %p1379_p5 = por %p61_p2, %p60_p1  ;;  %p66_p6 = scmp.ne.s32.totalorder %s1254_s16, %s1250_s15 }
  0x19   : > { %s1932_s26 = smov (%p40_p3, %s1930_s26), 0  ;;  %s1934_s29 = smov (!%p44_p4, %s43_s29), 5 }
  0x1a   : > { %1870 = sst [smem:[#allocation20_spill]] %s1932_s26  ;;  %s46_s4 = smul.u32 3, %s1932_s26 }
  0x1b   : > { %p67_p7 = scmp.eq.s32.totalorder %s883_s23, 0  ;;  %s110_s5 = ssub.s32 %s1274_s21, %s1932_s26 }
  0x1c   : > { %s113_s6 = sadd.s32 1, %s1246_s14  ;;  %s47_s7 = sadd.s32 %s46_s4, %s1928_s25 }
  0x1d   : > { %p1394_p8 = por %p67_p7, %p66_p6  ;;  %p48_p9 = scmp.lt.s32.totalorder %s47_s7, 5 }
  0x1e   : > { %p111_p10 = scmp.eq.s32.totalorder %s110_s5, 0  ;;  %p123_p11 = scmp.ne.s32.totalorder %s1246_s14, %s1242_s13 }
  0x1f   : > { %s1871_s8 = scalar_select %p1394_p8, 1, 0 }
  0x20   : > { %p124_p12 = scmp.eq.s32.totalorder %s883_s23, 5  ;;  %s1936_s7 = smov (!%p48_p9, %s47_s7), 5 }
  0x21   : > { %s1401_s9 = scalar_select %p111_p10, %s1246_s14, %s113_s6  }
  0x22   : > { %s50_s10 = ssub.s32 %s1934_s29, %s1936_s7  ;;  %p1404_p13 = por %p124_p12, %p123_p11 }
  0x23   : > { %p51_p0 = scmp.eq.s32.totalorder %s50_s10, 0  ;;  %p129_p1 = scmp.ne.s32.totalorder %s1242_s13, %s1238_s12 }
  0x24   : > { %s1872_s11 = scalar_select %p1404_p13, 1, 0 }
  0x25   : > { %p130_p2 = scmp.eq.s32.totalorder %s884_s24, 5  ;;  %p939_p4 = scmp.lt.s32.totalorder %s1278_s22, 6 }
  0x26   : > { %s1415_s15 = scalar_select %p51_p0, %s1258_s17, %s53_s28  }
  0x27   : > { %p1417_p3 = por %p130_p2, %p129_p1  ;;  %s1423_s23 = sand.u32 1, %s1258_s17  }
  0x28   : > { %1873 = sst [smem:[#allocation21_spill]] %s1415_s15  ;;  %s911_s4 = sshll.u32 %s1934_s29, 9 }
  0x29   : > { %s1874_s27 = scalar_select %p1417_p3, 1, 0 }
  0x2a   : > { %s887_s5 = sshll.u32 %s1423_s23, 6  ;;  %s1875_s0 = sld [smem:[#allocation22_spill]] }
  0x2b   : > { %s180_s24 = scalar_lea.vmem [#allocation4], %s887_s5  ;;  %p1434_p6 = pnand %p939_p4, %p1379_p5 }
  0x2c   : > { %s191_s28 = sshll.u32 %s180_s24, 4  ;;  %s1438_s28 = int_to_ptr.vmem [resolvable:$true] %s191_s28 }
  0x2d   : > { %p1062_p10 = pneg %p1434_p6 }
  0x30   : > { %s1430_s10 = scalar_lea.hbm %s1875_s0, %s911_s4  ;;  %s1065_s5 = scalar_lea.hbm %s1875_s0, 6144 }
  0x31   : > { %s1060_s6 = scalar_lea.hbm %s1430_s10, 1024  ;;  %p1066_p5 = scmp.lt.u32.totalorder %s1430_s10, %s1875_s0 }
  0x32   : > { %p1061_p9 = scmp.ne.s32.totalorder %s1430_s10, %s1060_s6  ;;  %p1067_p0 = scmp.lt.u32.totalorder %s1065_s5, %s1060_s6 }
  0x33   : > { %p1069_p2 = scmp.lt.u32.totalorder %s1060_s6, %s1430_s10 }
  0x34   : > { %p1063_p11 = pnand %p1062_p10, %p1061_p9  ;;  %p1068_p1 = por %p1067_p0, %p1066_p5 }
  0x36   : > { %p1064_p12 = pneg %p1063_p11  ;;  %p1070_p4 = por %p1069_p2, %p1068_p1 }
  0x38   : > { %p1071_p7 = pnand %p1070_p4, %p1064_p12 }
  0x3a   : > { %1074 = shalt.err (!%p1071_p7)
}
  0x3b   : > { %s1075_s25 = scalar_lea.vmem %s1438_s28, 1024  ;;  %s1280_s4 = smov [#allocation4]  }
  0x3c   : > { %p1076_p9 = scmp.ne.s32.totalorder %s1438_s28, %s1075_s25  ;;  %s1080_s30 = sshll.u32 %s1280_s4, 4  ;;  %s1081_s30 = int_to_ptr.vmem [resolvable:$false] %s1080_s30 }
  0x3d   : > { %s1082_s7 = scalar_lea.vmem %s1081_s30, 2048  ;;  %p1083_p13 = scmp.lt.s32.totalorder %s1438_s28, %s1081_s30 }
  0x3e   : > { %p1078_p11 = pnand %p1076_p9, %p1062_p10  ;;  %p1084_p5 = scmp.lt.s32.totalorder %s1082_s7, %s1075_s25 }
  0x40   : > { %p1079_p3 = pneg %p1078_p11  ;;  %p1085_p0 = por %p1084_p5, %p1083_p13 }
  0x42   : > { %p1086_p1 = pnand %p1085_p0, %p1079_p3 }
  0x44   : > { %1089 = shalt.err (!%p1086_p1)
}
  0x45   : > { %s1281_s6 = smov 3072   ;;  %s1282_s5 = smov 512  }
  0x46   : > { %s1283_s24 = smov 32   ;;  %s1877_s4 = scalar_lea.sflag [#allocation5], %s1423_s23 }
  0x47   : > { %928 = dma.hbm_to_vmem [thread:$0]  (!%p1434_p6), %s1430_s10, 1024, %s1438_s28, %s1877_s4, %s1281_s6, %s1282_s5, %s1283_s24  }
  0x48   : > { %p222_p7 = scmp.lt.s32.totalorder %s1278_s22, 7  ;;  %s890_s25 = sshll.u32 %s1423_s23, 2 }
  0x49   : > { %s912_s30 = sshll.u32 %s1934_s29, 6  ;;  %p1878_p13 = scmp.ge.s32.totalorder %s1278_s22, 1 }
  0x4a   : > { %s1481_s20 = scalar_lea.hbm %s1854_s1, %s912_s30  ;;  %s205_s15 = scalar_lea.vmem [#allocation7], %s890_s25 }
  0x4b   : > { %p1474_p3 = pnand %p1878_p13, %p222_p7  ;;  %s217_s17 = sshll.u32 %s205_s15, 4  ;;  %s218_s17 = int_to_ptr.vmem [resolvable:$true] %s217_s17 }
  0x4c   : > { %s202_s10 = scalar_lea.sflag [#allocation8], %s1423_s23  ;;  %s1090_s28 = scalar_lea.hbm %s1481_s20, 64 }
  0x4d   : > { %s1879_s7 = scalar_select %p1474_p3, 1, 0 }
  0x4e   : > { %p1091_p12 = scmp.ne.s32.totalorder %s1481_s20, %s1090_s28  ;;  %s1095_s0 = scalar_lea.hbm %s1854_s1, 384 }
  0x4f   : > { %p1096_p9 = scmp.lt.u32.totalorder %s1481_s20, %s1854_s1  ;;  %p1097_p11 = scmp.lt.u32.totalorder %s1095_s0, %s1090_s28 }
  0x50   : > { %p1093_p2 = pnand %p1091_p12, %p1062_p10  ;;  %p1099_p0 = scmp.lt.u32.totalorder %s1090_s28, %s1481_s20 }
  0x51   : > { %p1098_p5 = por %p1097_p11, %p1096_p9 }
  0x52   : > { %p1094_p4 = pneg %p1093_p2 }
  0x53   : > { %p1100_p1 = por %p1099_p0, %p1098_p5 }
  0x55   : > { %p1101_p7 = pnand %p1100_p1, %p1094_p4 }
  0x57   : > { %1104 = shalt.err (!%p1101_p7)
}
  0x58   : > { %s1105_s15 = scalar_lea.vmem %s218_s17, 64  ;;  %s1284_s23 = smov [#allocation7]  }
  0x59   : > { %p1106_p13 = scmp.ne.s32.totalorder %s218_s17, %s1105_s15  ;;  %s1110_s24 = sshll.u32 %s1284_s23, 4  ;;  %s1111_s24 = int_to_ptr.vmem [resolvable:$false] %s1110_s24 }
  0x5a   : > { %s1112_s4 = scalar_lea.vmem %s1111_s24, 128  ;;  %p1113_p8 = scmp.lt.s32.totalorder %s218_s17, %s1111_s24 }
  0x5b   : > { %p1108_p12 = pnand %p1106_p13, %p1062_p10  ;;  %p1114_p3 = scmp.lt.s32.totalorder %s1112_s4, %s1105_s15 }
  0x5d   : > { %p1109_p2 = pneg %p1108_p12  ;;  %p1115_p9 = por %p1114_p3, %p1113_p8 }
  0x5f   : > { %p1116_p11 = pnand %p1115_p9, %p1109_p2 }
  0x61   : > { %1119 = shalt.err (!%p1116_p11)
}
  0x62   : > { %931 = dma.hbm_to_vmem [thread:$0]  (!%p1434_p6), %s1481_s20, 64, %s218_s17, %s202_s10  }
  0x63   : > { %p1880_p4 = scmp.ne.s32.totalorder %s1879_s7, 0 }
  0x64   : > { %s228_s25 = sand.u32 (!%p1880_p4), 1, %s1254_s16   ;;  %p1881_p10 = scmp.ne.s32.totalorder (!%p1880_p4), %s1871_s8, 0 }
  0x65   : > { %226 = sbr.rel (%p1880_p4) target bundleno = 476 (0x1dc), region = 28  ;;  %s894_s30 = sshll.u32 (!%p1880_p4), %s228_s25, 6 }
  0x66   : > { %s229_s28 = scalar_lea.sflag (!%p1880_p4), [#allocation5], %s228_s25  ;;  %s232_s29 = scalar_lea.vmem (!%p1880_p4), [#allocation4], %s894_s30 }
  0x6c   : > { %1221 = dma.done.wait (%p1881_p10), %s229_s28, 1024  }
  0x6d   : > { %1223 = vsyncadd (%p1881_p10), %s229_s28, 4294966272  ;;  %s895_s6 = sshll.u32 %s228_s25, 2  ;;  %s238_s0 = scalar_lea.sflag [#allocation8], %s228_s25 }
  0x6e   : > { %s1510_s26 = scalar_lea.vmem [#allocation7], %s895_s6 }
  0x6f   : > { %1225 = dma.done.wait (%p1881_p10), %s238_s0, 64  }
  0x70   : > { %1227 = vsyncadd (%p1881_p10), %s238_s0, 4294967232  ;;  %s1517_s17 = sand.u32 1, %s1242_s13   ;;  %p898_p8 = scmp.ne.s32.totalorder %s1262_s18, 0 }
  0x71   : > { %s896_s20 = sshll.u32 %s1517_s17, 3  ;;  %v288_v0 = vlaneseq (!%p898_p8)  ;;  %v1285_v1 = vmov (!%p898_p8), 0.0  }
  0x72   : > { %s1520_s7 = scalar_lea.vmem [#allocation9], %s896_s20  ;;  %s1522_s10 = scalar_lea.vmem [#allocation10], %s896_s20 }
  0x73   : > { %287 = sbr.rel (%p898_p8) target bundleno = 122 (0x7a), region = 40  ;;  %vm290_vm0 = vcmp.lt.s32.totalorder (!%p898_p8), %v288_v0, 512 }
  0x74   : > { %292 = vst.msk [vmem:[#allocation2] sm:$0xf] (!%p898_p8), %vm290_vm0, %v1285_v1  ;;  %293 = vst.msk [vmem:[#allocation3] sm:$0xf] (!%p898_p8), %vm290_vm0, %v1285_v1 }
  0x7a PF: > { %v294_v2 = vld [vmem:[%s232_s29] sm:$0xff]  ;;  %v295_v3 = vld [vmem:[%s232_s29 + $0x8] sm:$0xff]  ;;  %v296_v4 = vld [vmem:[%s232_s29 + $0x10] sm:$0xff]  ;;  %v383_v5 = vlaneseq  ;;  %s458_s8 = smul.u32 3, %s1266_s19  ;;  %p904_p6 = scmp.ne.s32.totalorder %s1262_s18, 2 }
  0x7b   : > { %v297_v6 = vld [vmem:[%s232_s29 + $0x18] sm:$0xff]  ;;  %v298_v7 = vld [vmem:[%s232_s29 + $0x20] sm:$0xff]  ;;  %v299_v8 = vld [vmem:[%s232_s29 + $0x28] sm:$0xff] }
  0x7c   : > { %v300_v9 = vld [vmem:[%s232_s29 + $0x30] sm:$0xff]  ;;  %v301_v10 = vld [vmem:[%s232_s29 + $0x38] sm:$0xff]  ;;  %v303_v11 = vmax.f32 %v294_v2, %v298_v7  ;;  %v310_v12 = vmax.f32 %v295_v3, %v299_v8  ;;  %v1526_v15 = vshrl.u32 %v383_v5, 7  ;;  %v1535_v26 = vld [vmem:[%s1510_s26] sm:$0xf]  ;;  %v1553_v45 = vand.u32 127, %v383_v5  ;;  %s459_s21 = sadd.s32 %s1262_s18, %s458_s8 }
  0x7d   : > { %v317_v13 = vmax.f32 %v296_v4, %v300_v9  ;;  %v324_v14 = vmax.f32 %v297_v6, %v301_v10  ;;  %vm472_vm1 = vcmp.ne.s32.totalorder %v1535_v26, 0  ;;  %s899_s5 = sshll.u32 %s459_s21, 9  ;;  %vm498_vm8 = vcmp.ge.s32.totalorder %v1535_v26, 0 }
  0x7e   : > { %v304_v16 = vrot.slane %v303_v11, 4  ;;  %v311_v17 = vrot.slane %v310_v12, 4  ;;  %v1529_v24 = vsub.s32 0, %v1526_v15  ;;  %v1532_v25 = vsub.s32 1, %v1526_v15  ;;  %s466_s15 = ssub.s32 3000, %s899_s5 }
  0x7f   : > { %v318_v18 = vrot.slane %v317_v13, 4  ;;  %v325_v19 = vrot.slane %v324_v14, 4  ;;  %v1538_v29 = vsub.s32 2, %v1526_v15  ;;  %v1541_v32 = vsub.s32 3, %v1526_v15 }
  0x80   : > { %v305_v20 = vmax.f32 %v303_v11, %v304_v16  ;;  %v312_v21 = vmax.f32 %v310_v12, %v311_v17  ;;  %v389_v37 = vrot.slane %v1535_v26, %v1529_v24  ;;  %v393_v38 = vrot.slane %v1535_v26, %v1532_v25 }
  0x81   : > { %v319_v22 = vmax.f32 %v317_v13, %v318_v18  ;;  %v326_v23 = vmax.f32 %v324_v14, %v325_v19  ;;  %v397_v41 = vrot.slane %v1535_v26, %v1538_v29  ;;  %v401_v44 = vrot.slane %v1535_v26, %v1541_v32 }
  0x82   : > { %v306_v27 = vrot.slane %v305_v20, 2  ;;  %v313_v28 = vrot.slane %v312_v21, 2  ;;  %v385_v48 = vadd.s32 8, %v1526_v15  ;;  %vm402_vm2 = vcmp.eq.s32.totalorder %v1526_v15, %v389_v37 }
  0x83   : > { %v320_v30 = vrot.slane %v319_v22, 2  ;;  %v327_v31 = vrot.slane %v326_v23, 2  ;;  %vm403_vm3 = vcmp.eq.s32.totalorder %v1526_v15, %v393_v38  ;;  %vm404_vm4 = vcmp.eq.s32.totalorder %v1526_v15, %v397_v41 }
  0x84   : > { %v307_v33 = vmax.f32 %v305_v20, %v306_v27  ;;  %v314_v34 = vmax.f32 %v312_v21, %v313_v28  ;;  %vm405_vm5 = vcmp.eq.s32.totalorder %v1526_v15, %v401_v44  ;;  %vm406_vm6 = vcmp.eq.s32.totalorder %v385_v48, %v389_v37 }
  0x85   : > { %v321_v35 = vmax.f32 %v319_v22, %v320_v30  ;;  %v328_v36 = vmax.f32 %v326_v23, %v327_v31  ;;  %vm407_vm7 = vcmp.eq.s32.totalorder %v385_v48, %v393_v38  ;;  %vm408_vm9 = vcmp.eq.s32.totalorder %v385_v48, %v397_v41 }
  0x86   : > { %v308_v39 = vrot.slane %v307_v33, 1  ;;  %v315_v40 = vrot.slane %v314_v34, 1  ;;  %vm409_vm10 = vcmp.eq.s32.totalorder %v385_v48, %v401_v44  ;;  %v462_v1 = vadd.s32 128, %v1553_v45 }
  0x87   : > { %v322_v42 = vrot.slane %v321_v35, 1  ;;  %v329_v43 = vrot.slane %v328_v36, 1 }
  0x88   : > { %v309_v46 = vmax.f32 %v307_v33, %v308_v39  ;;  %v316_v47 = vmax.f32 %v314_v34, %v315_v40 }
  0x89   : > { %v323_v49 = vmax.f32 %v321_v35, %v322_v42  ;;  %v330_v50 = vmax.f32 %v328_v36, %v329_v43 }
  0x8a   : > { %v331_v51 = vsub.f32 %v294_v2, %v309_v46  ;;  %v332_v52 = vsub.f32 %v295_v3, %v316_v47  ;;  %v335_v53 = vsub.f32 %v298_v7, %v309_v46  ;;  %v336_v56 = vsub.f32 %v299_v8, %v316_v47 }
  0x8b   : > { %v333_v54 = vsub.f32 %v296_v4, %v323_v49  ;;  %v334_v55 = vsub.f32 %v297_v6, %v330_v50  ;;  %v337_v57 = vsub.f32 %v300_v9, %v323_v49  ;;  %v338_v60 = vsub.f32 %v301_v10, %v330_v50 }
  0x8c   : > { %v339_v58 = vmul.f32 1.442695, %v331_v51  ;;  %v341_v59 = vmul.f32 1.442695, %v332_v52  ;;  %v347_v63 = vmul.f32 1.442695, %v335_v53  ;;  %v467_v10 = vstv %s466_s15 }
  0x8d   : > { %v343_v61 = vmul.f32 1.442695, %v333_v54  ;;  %v345_v62 = vmul.f32 1.442695, %v334_v55  ;;  %v349_v0 = vmul.f32 1.442695, %v336_v56  ;;  %vm468_vm11 = vcmp.lt.s32.totalorder %v1553_v45, %v467_v10 }
  0x8e   : > { %1036 = vpow2.f32 %v339_v58  ;;  %v1286_v2 = vmov 0   ;;  %v351_v4 = vmul.f32 1.442695, %v337_v57  ;;  %v463_v6 = vadd.s32 256, %v1553_v45 }
  0x8f   : > { %1038 = vpow2.f32 %v341_v59  ;;  %v473_v3 = vsel %vm472_vm1, 1, %v1286_v2  ;;  %v464_v7 = vadd.s32 384, %v1553_v45  ;;  %v353_v8 = vmul.f32 1.442695, %v338_v60 }
  0x90   : > { %1040 = vpow2.f32 %v343_v61  ;;  %v410_v9 = vsel %vm402_vm2, %v331_v51, 0.0  ;;  %v411_v11 = vsel %vm403_vm3, %v332_v52, 0.0  ;;  %v414_v12 = vsel %vm406_vm6, %v335_v53, 0.0 }
  0x91   : > { %1042 = vpow2.f32 %v345_v62  ;;  %v477_v13 = vrot.slane %v473_v3, %v1529_v24  ;;  %v412_v14 = vsel %vm404_vm4, %v333_v54, 0.0  ;;  %v415_v16 = vsel %vm407_vm7, %v336_v56, 0.0 }
  0x92   : > { %1044 = vpow2.f32 %v347_v63  ;;  %v481_v17 = vrot.slane %v473_v3, %v1532_v25  ;;  %v413_v18 = vsel %vm405_vm5, %v334_v55, 0.0  ;;  %v416_v19 = vsel %vm408_vm9, %v337_v57, 0.0 }
  0x93   : > { %1046 = vpow2.f32 %v349_v0  ;;  %v485_v20 = vrot.slane %v473_v3, %v1538_v29  ;;  %v417_v21 = vsel %vm409_vm10, %v338_v60, 0.0  ;;  %v418_v22 = vadd.f32 %v414_v12, %v410_v9 }
  0x94   : > { %1048 = vpow2.f32 %v351_v4  ;;  %v489_v23 = vrot.slane %v473_v3, %v1541_v32  ;;  %v425_v27 = vadd.f32 %v415_v16, %v411_v11  ;;  %vm490_vm12 = vcmp.ne.s32.totalorder %v477_v13, 0 }
  0x95   : > { %1050 = vpow2.f32 %v353_v8  ;;  %vm469_vm13 = vcmp.lt.s32.totalorder %v462_v1, %v467_v10  ;;  %vm470_vm14 = vcmp.lt.s32.totalorder %v463_v6, %v467_v10  ;;  %vm471_vm15 = vcmp.lt.s32.totalorder %v464_v7, %v467_v10  ;;  %vm1599_vm3 = vmand %vm468_vm11, %vm490_vm12 }
  0x96   : > { %vm491_vm0 = vcmp.ne.s32.totalorder %v481_v17, 0  ;;  %v432_v30 = vadd.f32 %v416_v19, %v412_v14  ;;  %v1586_v31 = vadd.f32 %v417_v21, %v413_v18  ;;  %vm1588_vm1 = vcmp.ne.s32.totalorder %v485_v20, 0 }
  0x97   : > { %v499_v34 = vsel %vm498_vm8, 1, %v1286_v2  ;;  %v419_v36 = vrot.slane %v418_v22, 4  ;;  %vm1595_vm2 = vcmp.ne.s32.totalorder %v489_v23, 0  ;;  %v426_v42 = vrot.slane %v425_v27, 4  ;;  %vm1606_vm4 = vmand %vm469_vm13, %vm491_vm0 }
  0x98   : > { %v1037_v28 = vpop.eup %1036  ;;  %v503_v39 = vrot.slane %v499_v34, %v1529_v24  ;;  %v507_v40 = vrot.slane %v499_v34, %v1532_v25  ;;  %v511_v44 = vrot.slane %v499_v34, %v1538_v29  ;;  %v515_v45 = vrot.slane %v499_v34, %v1541_v32  ;;  %vm1616_vm6 = vmand %vm470_vm14, %vm1588_vm1 }
  0x99   : > { %v1039_v35 = vpop.eup %1038  ;;  %vm524_vm5 = vcmp.lt.s32.totalorder %v1535_v26, 16  ;;  %v433_v51 = vrot.slane %v432_v30, 4  ;;  %vm1631_vm9 = vmand %vm471_vm15, %vm1595_vm2  ;;  %v440_v55 = vrot.slane %v1586_v31, 4  ;;  %v1649_v60 = vadd.f32 %v419_v36, %v418_v22 }
  0x9a   : > { %v1041_v41 = vpop.eup %1040  ;;  %vm1620_vm7 = vcmp.ne.s32.totalorder %v503_v39, 0  ;;  %vm1624_vm8 = vcmp.ne.s32.totalorder %v507_v40, 0  ;;  %vm1635_vm10 = vcmp.ne.s32.totalorder %v511_v44, 0  ;;  %vm1640_vm11 = vcmp.ne.s32.totalorder %v515_v45, 0 }
  0x9b   : > { %v1043_v46 = vpop.eup %1042  ;;  %vm520_vm12 = vmand %vm1599_vm3, %vm1620_vm7  ;;  %v525_v57 = vsel %vm524_vm5, 1, %v1286_v2  ;;  %v1651_v61 = vadd.f32 %v426_v42, %v425_v27  ;;  %v1287_v14 = vmov 1966171168   ;;  %v434_v19 = vadd.f32 %v433_v51, %v432_v30 }
  0x9c   : > { %v1045_v50 = vpop.eup %1044  ;;  %vm521_vm13 = vmand %vm1606_vm4, %vm1624_vm8  ;;  %v529_v62 = vrot.slane %v525_v57, %v1529_v24  ;;  %v533_v2 = vrot.slane %v525_v57, %v1532_v25  ;;  %v537_v3 = vrot.slane %v525_v57, %v1538_v29  ;;  %v541_v7 = vrot.slane %v525_v57, %v1541_v32 }
  0x9d   : > { %v1047_v53 = vpop.eup %1046  ;;  %v355_v54 = vadd.f32 %v1045_v50, %v1037_v28  ;;  %v562_v16 = vunpack.c.l.s4 %v1287_v14  ;;  %vm1906_vm3 = vmand %vm1616_vm6, %vm1635_vm10  ;;  %v1288_v21 = vmov 0.0   ;;  %v441_v44 = vadd.f32 %v440_v55, %v1586_v31 }
  0x9e   : > { %v1049_v58 = vpop.eup %1048  ;;  %v362_v59 = vadd.f32 %v1047_v53, %v1039_v35  ;;  %vm542_vm0 = vcmp.ne.s32.totalorder %v529_v62, 0  ;;  %vm543_vm1 = vcmp.ne.s32.totalorder %v533_v2, 0  ;;  %vm544_vm2 = vcmp.ne.s32.totalorder %v537_v3, 0  ;;  %vm1909_vm4 = vmand %vm1631_vm9, %vm1640_vm11 }
  0x9f   : > { %v1051_v63 = vpop.eup %1050  ;;  %v356_v0 = vrot.slane %v355_v54, 4  ;;  %v369_v1 = vadd.f32 %v1049_v58, %v1041_v41  ;;  %vm1674_vm5 = vmand %vm520_vm12, %vm542_vm0  ;;  %vm545_vm14 = vcmp.ne.s32.totalorder %v541_v7, 0  ;;  %v563_v30 = vunpack.c.0.s8 %v562_v16 }
  0xa0   : > { %v363_v4 = vrot.slane %v362_v59, 4  ;;  %v376_v6 = vadd.f32 %v1051_v63, %v1043_v46  ;;  %vm1683_vm15 = vmand %vm521_vm13, %vm543_vm1  ;;  %v900_v22 = vsel %vm1674_vm5, 1.0, %v1288_v21  ;;  %v421_v48 = vrot.slane %v1649_v60, 2 }
  0xa1   : > { %v357_v8 = vadd.f32 %v356_v0, %v355_v54  ;;  %v370_v9 = vrot.slane %v369_v1, 4  ;;  %vm1692_vm7 = vmand %vm1906_vm3, %vm544_vm2  ;;  %v901_v33 = vsel %vm1683_vm15, 1.0, %v1288_v21  ;;  %v1714_v40 = vsub.s32 %v563_v30, %v1526_v15 }
  0xa2   : > { %v364_v11 = vadd.f32 %v363_v4, %v362_v59  ;;  %v377_v12 = vrot.slane %v376_v6, 4  ;;  %vm1703_vm8 = vmand %vm1909_vm4, %vm545_vm14  ;;  %v902_v36 = vsel %vm1692_vm7, 1.0, %v1288_v21  ;;  %v603_v41 = vcombine.low %v900_v22, %v901_v33  ;;  %v590_v59 = vld [vmem:[#allocation3] sm:$0xf] }
  0xa3   : > { %v358_v17 = vrot.slane %v357_v8, 2  ;;  %v371_v18 = vadd.f32 %v370_v9, %v369_v1  ;;  %v903_v37 = vsel %vm1703_vm8, 1.0, %v1288_v21  ;;  %v428_v26 = vrot.slane %v1651_v61, 2 }
  0xa4   : > { %v365_v23 = vrot.slane %v364_v11, 2  ;;  %v378_v27 = vadd.f32 %v377_v12, %v376_v6  ;;  %v604_v45 = vcombine.low %v902_v36, %v903_v37  ;;  %v611_v49 = vrot.slane %v603_v41, %v1714_v40 }
  0xa5   : > { %v359_v34 = vadd.f32 %v358_v17, %v357_v8  ;;  %v372_v35 = vrot.slane %v371_v18, 2  ;;  %v435_v54 = vrot.slane %v434_v19, 2  ;;  %v442_v57 = vrot.slane %v441_v44, 2 }
  0xa6   : > { %v366_v38 = vadd.f32 %v365_v23, %v364_v11  ;;  %v379_v39 = vrot.slane %v378_v27, 2  ;;  %v618_v52 = vrot.slane %v604_v45, %v1714_v40  ;;  %v422_v58 = vadd.f32 %v421_v48, %v1649_v60 }
  0xa7   : > { %v360_v42 = vrot.slane %v359_v34, 1  ;;  %v373_v43 = vadd.f32 %v372_v35, %v371_v18  ;;  %v429_v62 = vadd.f32 %v428_v26, %v1651_v61  ;;  %v436_v0 = vadd.f32 %v435_v54, %v434_v19 }
  0xa8   : > { %v367_v46 = vrot.slane %v366_v38, 1  ;;  %v380_v47 = vadd.f32 %v379_v39, %v378_v27  ;;  %v619_v31 = vcombine.low %v611_v49, %v618_v52  ;;  %vm1725_vm6 = vcmp.lt.s32.totalorder %v383_v5, 512 }
  0xa9   : > { %v361_v50 = vadd.f32 %v360_v42, %v359_v34  ;;  %v374_v51 = vrot.slane %v373_v43, 1  ;;  %v443_v2 = vadd.f32 %v442_v57, %v441_v44  ;;  %v423_v4 = vrot.slane %v422_v58, 1 }
  0xaa   : > { %v368_v15 = vadd.f32 %v367_v46, %v366_v38  ;;  %v381_v53 = vrot.slane %v380_v47, 1  ;;  %v626_v63 = vrot.slane %v619_v31, %v1714_v40  ;;  %v430_v6 = vrot.slane %v429_v62, 1 }
  0xab   : > { %v375_v56 = vadd.f32 %v374_v51, %v373_v43  ;;  %1052 = vlog2.f32 %v361_v50  ;;  %v437_v60 = vrot.slane %v436_v0, 1  ;;  %v444_v7 = vrot.slane %v443_v2, 1  ;;  %v550_v43 = vld [vmem:[#allocation2] sm:$0xf] }
  0xac   : > { %v382_v55 = vadd.f32 %v381_v53, %v380_v47  ;;  %1054 = vlog2.f32 %v368_v15  ;;  %v628_v3 = vadd.f32 %v626_v63, %v590_v59  ;;  %v424_v61 = vadd.f32 %v423_v4, %v422_v58 }
  0xad   : > { %1056 = vlog2.f32 %v375_v56  ;;  %v431_v9 = vadd.f32 %v430_v6, %v429_v62  ;;  %v438_v12 = vadd.f32 %v437_v60, %v436_v0  ;;  %v445_v5 = vadd.f32 %v444_v7, %v443_v2 }
  0xae   : > { %1058 = vlog2.f32 %v382_v55  ;;  %629 = vst.msk [vmem:[#allocation3] sm:$0xf] %vm1725_vm6, %v628_v3  ;;  %vm656_vm9 = vcmask (!%p904_p6), 1040384  }
  0xb5   : > { %v1053_v8 = vpop.eup %1052  ;;  %v675_v20 = vld [vmem:[#allocation3] sm:$0xf] (!%p904_p6) }
  0xb6   : > { %v1055_v11 = vpop.eup %1054  ;;  %v447_v14 = vmul.f32 0.6931472, %v1053_v8  ;;  %v684_v48 = vrot.slane (!%p904_p6), %v675_v20, %v1532_v25  ;;  %v688_v49 = vrot.slane (!%p904_p6), %v675_v20, %v1538_v29  ;;  %v692_v52 = vrot.slane (!%p904_p6), %v675_v20, %v1541_v32 }
  0xb7   : > { %v1057_v16 = vpop.eup %1056  ;;  %v449_v17 = vmul.f32 0.6931472, %v1055_v11 }
  0xb8   : > { %v1059_v18 = vpop.eup %1058  ;;  %v451_v19 = vmul.f32 0.6931472, %v1057_v16  ;;  %v454_v21 = vsub.f32 %v447_v14, %v424_v61  ;;  %v698_v54 = vsel (!%p904_p6), %vm656_vm9, %v684_v48, 0.0  ;;  %v700_v56 = vsel (!%p904_p6), %vm656_vm9, %v688_v49, 0.0 }
  0xb9   : > { %v453_v22 = vmul.f32 0.6931472, %v1059_v18  ;;  %v455_v23 = vsub.f32 %v449_v17, %v431_v9  ;;  %v702_v31 = vsel (!%p904_p6), %vm656_vm9, %v692_v52, 0.0 }
  0xba   : > { %v456_v27 = vsub.f32 %v451_v19, %v438_v12  ;;  %v551_v30 = vsel %vm1674_vm5, %v454_v21, 0.0 }
  0xbb   : > { %v457_v33 = vsub.f32 %v453_v22, %v445_v5  ;;  %v552_v34 = vsel %vm1683_vm15, %v455_v23, 0.0 }
  0xbc   : > { %v553_v35 = vsel %vm1692_vm7, %v456_v27, 0.0  ;;  %v559_v36 = vcombine.low %v551_v30, %v552_v34 }
  0xbd   : > { %v554_v37 = vsel %vm1703_vm8, %v457_v33, 0.0 }
  0xbe   : > { %v560_v38 = vcombine.low %v553_v35, %v554_v37  ;;  %v567_v39 = vrot.slane %v559_v36, %v1714_v40 }
  0xc0   : > { %v574_v41 = vrot.slane %v560_v38, %v1714_v40 }
  0xc2   : > { %v575_v42 = vcombine.low %v567_v39, %v574_v41  ;;  %633 = sbr.rel (%p904_p6) target bundleno = 427 (0x1ab), region = 44 }
  0xc4   : > { %v582_v10 = vrot.slane %v575_v42, %v1714_v40  ;;  %v680_v40 = vrot.slane (!%p904_p6), %v675_v20, %v1529_v24 }
  0xc6   : > { %v584_v44 = vadd.f32 %v582_v10, %v550_v43  ;;  %v697_v53 = vsel (!%p904_p6), %vm656_vm9, %v680_v40, 0.0 }
  0xc8   : > { %589 = vst.msk [vmem:[#allocation2] sm:$0xf] %vm1725_vm6, %v584_v44 }
  0xcf   : > { %v634_v13 = vld [vmem:[#allocation2] sm:$0xf] }
  0xd0   : > { %v639_v28 = vrot.slane %v634_v13, %v1529_v24  ;;  %v643_v45 = vrot.slane %v634_v13, %v1532_v25  ;;  %v647_v46 = vrot.slane %v634_v13, %v1538_v29  ;;  %v651_v47 = vrot.slane %v634_v13, %v1541_v32 }
  0xd1   : > { %v699_v25 = vadd.f32 %v698_v54, %v697_v53 }
  0xd2   : > { %v657_v50 = vsel %vm656_vm9, %v639_v28, 0.0  ;;  %v658_v51 = vsel %vm656_vm9, %v643_v45, 0.0  ;;  %v660_v26 = vsel %vm656_vm9, %v647_v46, 0.0  ;;  %v662_v24 = vsel %vm656_vm9, %v651_v47, 0.0 }
  0xd3   : > { %v659_v15 = vadd.f32 %v658_v51, %v657_v50  ;;  %v701_v29 = vadd.f32 %v700_v56, %v699_v25 }
  0xd5   : > { %v661_v57 = vadd.f32 %v660_v26, %v659_v15  ;;  %v703_v58 = vadd.f32 %v702_v31, %v701_v29 }
  0xd7   : > { %v663_v55 = vadd.f32 %v662_v24, %v661_v57 }
  0xd9   : > { %664 = vadd.xlane.f32.xlu0 %v663_v55 }
  0xdd   : > { %704 = vadd.xlane.f32.xlu0 %v703_v58 }
 0x166   : > { %v665_v59 = vpop.xlane.xlu0 %664 }
 0x167   : > { %v666_v32 = vrot.slane %v665_v59, 4 }
 0x169   : > { %v667_v62 = vadd.f32 %v666_v32, %v665_v59 }
 0x16a   : > { %v705_v63 = vpop.xlane.xlu0 %704 }
 0x16b   : > { %v668_v0 = vrot.slane %v667_v62, 2  ;;  %v706_v1 = vrot.slane %v705_v63, 4 }
 0x16d   : > { %v707_v2 = vadd.f32 %v706_v1, %v705_v63  ;;  %v669_v3 = vadd.f32 %v668_v0, %v667_v62 }
 0x16f   : > { %v708_v4 = vrot.slane %v707_v2, 2  ;;  %v670_v6 = vrot.slane %v669_v3, 1 }
 0x171   : > { %v709_v60 = vadd.f32 %v708_v4, %v707_v2  ;;  %v671_v7 = vadd.f32 %v670_v6, %v669_v3 }
 0x173   : > { %913 = vpush %v671_v7  ;;  %v710_v61 = vrot.slane %v709_v60, 1 }
 0x175   : > { %v711_v8 = vadd.f32 %v710_v61, %v709_v60 }
 0x177   : > { %915 = vpush %v711_v8 }
 0x1a4   : > { %s914_s18 = spop %913 }
 0x1a5   : > { %v673_v9 = vstv %s914_s18 }
 0x1a6   : > { %674 = vst [vmem:[%s1520_s7] sm:$0xff] %v673_v9 }
 0x1a8   : > { %s916_s23 = spop %915 }
 0x1a9   : > { %v713_v11 = vstv %s916_s23 }
 0x1aa   : > { %714 = vst [vmem:[%s1522_s10] sm:$0xff] %v713_v11 }
 0x1ab PF: > { %s907_s24 = sshll.u32 %s1266_s19, 7  ;;  %s734_s28 = sshll.u32 %s1520_s7, 4  ;;  %s735_s28 = int_to_ptr.vmem [resolvable:$true] %s734_s28 }
 0x1ac   : > { %s1769_s30 = scalar_lea.hbm %s1855_s2, %s907_s24  ;;  %s716_s29 = scalar_lea.sflag [#allocation6], %s1517_s17 }
 0x1ad   : > { %s1120_s6 = scalar_lea.vmem %s735_s28, 128  ;;  %p1914_p5 = scmp.ne.s32.totalorder %s1872_s11, 0 }
 0x1ae   : > { %p1121_p3 = scmp.ne.s32.totalorder %s735_s28, %s1120_s6  ;;  %s1289_s0 = smov [#allocation9]  }
 0x1af   : > { %s1124_s26 = sshll.u32 %s1289_s0, 4  ;;  %s1125_s26 = int_to_ptr.vmem [resolvable:$false] %s1124_s26 }
 0x1b0   : > { %p1122_p0 = pnand %p1121_p3, %p1914_p5  ;;  %s1126_s20 = scalar_lea.vmem %s1125_s26, 256 }
 0x1b1   : > { %p1127_p7 = scmp.lt.s32.totalorder %s735_s28, %s1125_s26  ;;  %p1128_p13 = scmp.lt.s32.totalorder %s1126_s20, %s1120_s6 }
 0x1b2   : > { %p1123_p1 = pneg %p1122_p0 }
 0x1b3   : > { %p1129_p12 = por %p1128_p13, %p1127_p7 }
 0x1b5   : > { %p1130_p2 = pnand %p1129_p12, %p1123_p1 }
 0x1b7   : > { %1133 = shalt.err (!%p1130_p2)
}
 0x1b8   : > { %s1134_s7 = scalar_lea.hbm %s1769_s30, 128  ;;  %s1138_s5 = scalar_lea.hbm %s1855_s2, 256 }
 0x1b9   : > { %p1135_p9 = scmp.ne.s32.totalorder %s1769_s30, %s1134_s7  ;;  %p1139_p10 = scmp.lt.u32.totalorder %s1769_s30, %s1855_s2 }
 0x1ba   : > { %p1140_p8 = scmp.lt.u32.totalorder %s1138_s5, %s1134_s7  ;;  %p1142_p3 = scmp.lt.u32.totalorder %s1134_s7, %s1769_s30 }
 0x1bb   : > { %p1136_p11 = pnand %p1135_p9, %p1914_p5 }
 0x1bc   : > { %p1141_p6 = por %p1140_p8, %p1139_p10 }
 0x1bd   : > { %p1137_p4 = pneg %p1136_p11 }
 0x1be   : > { %p1143_p0 = por %p1142_p3, %p1141_p6 }
 0x1c0   : > { %p1144_p1 = pnand %p1143_p0, %p1137_p4 }
 0x1c2   : > { %1147 = shalt.err (!%p1144_p1)
}
 0x1c3   : > { %921 = dma.vmem_to_hbm [thread:$0]  (%p1914_p5), %s735_s28, 128, %s1769_s30, %s716_s29  }
 0x1c4   : > { %s1795_s25 = scalar_lea.hbm %s1856_s3, %s907_s24  ;;  %s747_s6 = sshll.u32 %s1522_s10, 4  ;;  %s748_s6 = int_to_ptr.vmem [resolvable:$true] %s747_s6 }
 0x1c5   : > { %s721_s0 = scalar_lea.sflag [#allocation11], %s1517_s17  ;;  %s1148_s26 = scalar_lea.vmem %s748_s6, 128 }
 0x1c6   : > { %p1149_p7 = scmp.ne.s32.totalorder %s748_s6, %s1148_s26  ;;  %s1290_s20 = smov [#allocation10]  }
 0x1c7   : > { %s1152_s7 = sshll.u32 %s1290_s20, 4  ;;  %s1153_s7 = int_to_ptr.vmem [resolvable:$false] %s1152_s7 }
 0x1c8   : > { %p1150_p13 = pnand %p1149_p7, %p1914_p5  ;;  %s1154_s8 = scalar_lea.vmem %s1153_s7, 256 }
 0x1c9   : > { %p1155_p2 = scmp.lt.s32.totalorder %s748_s6, %s1153_s7  ;;  %p1156_p9 = scmp.lt.s32.totalorder %s1154_s8, %s1148_s26 }
 0x1ca   : > { %p1151_p12 = pneg %p1150_p13 }
 0x1cb   : > { %p1157_p11 = por %p1156_p9, %p1155_p2 }
 0x1cd   : > { %p1158_p4 = pnand %p1157_p11, %p1151_p12 }
 0x1cf   : > { %1161 = shalt.err (!%p1158_p4)
}
 0x1d0   : > { %s1162_s19 = scalar_lea.hbm %s1795_s25, 128  ;;  %s1166_s24 = scalar_lea.hbm %s1856_s3, 256 }
 0x1d1   : > { %p1163_p10 = scmp.ne.s32.totalorder %s1795_s25, %s1162_s19  ;;  %p1167_p3 = scmp.lt.u32.totalorder %s1795_s25, %s1856_s3 }
 0x1d2   : > { %p1168_p0 = scmp.lt.u32.totalorder %s1166_s24, %s1162_s19  ;;  %p1170_p7 = scmp.lt.u32.totalorder %s1162_s19, %s1795_s25 }
 0x1d3   : > { %p1164_p8 = pnand %p1163_p10, %p1914_p5 }
 0x1d4   : > { %p1169_p1 = por %p1168_p0, %p1167_p3 }
 0x1d5   : > { %p1165_p6 = pneg %p1164_p8 }
 0x1d6   : > { %p1171_p13 = por %p1170_p7, %p1169_p1 }
 0x1d8   : > { %p1172_p12 = pnand %p1171_p13, %p1165_p6 }
 0x1da   : > { %1175 = shalt.err (!%p1172_p12)
}
 0x1db   : > { %922 = dma.vmem_to_hbm [thread:$0]  (%p1914_p5), %s748_s6, 128, %s1795_s25, %s721_s0  }
 0x1dc PF: > { %p940_p2 = scmp.ge.s32.totalorder %s1278_s22, 2  ;;  %s759_s29 = sand.u32 1, %s1238_s12  }
 0x1dd   : > { %p1915_p9 = scmp.ne.s32.totalorder %s1874_s27, 0  ;;  %s760_s21 = scalar_lea.sflag [#allocation6], %s759_s29 }
 0x1df   : > { %p933_p11 = pnand %p940_p2, %p1915_p9 }
 0x1e1   : > { %1229 = dma.done.wait (!%p933_p11), %s760_s21, 128  }
 0x1e2   : > { %1231 = vsyncadd (!%p933_p11), %s760_s21, 4294967168  ;;  %s769_s5 = scalar_lea.sflag [#allocation11], %s759_s29 }
 0x1e3   : > { %1233 = dma.done.wait (!%p933_p11), %s769_s5, 128  }
 0x1e4   : > { %1235 = vsyncadd (!%p933_p11), %s769_s5, 4294967168  ;;  %s26_s22 = sadd.s32 1, %s1278_s22   ;;  %s1916_s11 = sld [smem:[#allocation16_spill]] }
 0x1e5   : > { %p23_p4 = scmp.ge.s32.totalorder %s26_s22, 8   ;;  %s1917_s17 = sld [smem:[#allocation21_spill]] }
 0x1e6   : > { %s1918_s18 = sld [smem:[#allocation17_spill]]  ;;  %s1919_s19 = sld [smem:[#allocation18_spill]] }
 0x1e7   : > { %s1920_s20 = sld [smem:[#allocation19_spill]]  ;;  %s1921_s21 = sld [smem:[#allocation20_spill]] }
 0x1e8   : > { %s1922_s12 = smov %s1242_s13  ;;  %s1923_s13 = smov %s1246_s14 }
 0x1e9   : > { %s1924_s14 = smov %s1401_s9  ;;  %s1925_s15 = smov %s1254_s16 }
 0x1ea   : > { %s1926_s16 = smov %s1916_s11  ;;  %25 = sbr.rel (!%p23_p4) target bundleno = 15 (0xf), region = 111 }
 0x1f1   :  { %774 = vsyncpa [#allocation5], 1 }
 0x1f2   :  { %776 = vsyncpa [#allocation5 + $0x1], 1 }
 0x1f3   :  { %777 = vsyncpa [#allocation8], 1 }
 0x1f4   :  { %779 = vsyncpa [#allocation8 + $0x1], 1 }
 0x1f5   :  { %780 = vsyncpa [#allocation6], 1 }
 0x1f6   :  { %782 = vsyncpa [#allocation6 + $0x1], 1 }
 0x1f7   :  { %783 = vsyncpa [#allocation11], 1 }
 0x1f8   :  { %785 = vsyncpa [#allocation11 + $0x1], 1 }

</bundles_post_ra>
